<compile_context>
chip_gen: v6e
topology: v6e:2x2x1
jax: 0.10.0
libtpu: 0.0.40
codegen_flags: <defaults>
</compile_context>

<pallas_src>
import functools

import jax
import jax.numpy as jnp
from jax.experimental import pallas as pl
from jax.experimental.pallas import tpu as pltpu

_LANE = 128


def _mlp_kernel(x_ref, w12_ref, b12_ref, w3_ref, b3_ref, o_ref):
    # Fused Linear1+Linear2: x @ W12 + b12   (bf16 operands, f32 accumulation)
    h = jnp.dot(x_ref[...], w12_ref[...],
                preferred_element_type=jnp.float32) + b12_ref[...]
    # ReLU (+ Dropout == identity in eval)
    h = jnp.maximum(h, 0.0)
    # TODO(synk): training-mode Dropout (random mask + 1/(1-p) scale) not applied;
    #             forward here matches eval() semantics.
    # module3: Linear(hidden_size -> num_classes), padded to 128 output lanes.
    o_ref[...] = (jnp.dot(h.astype(w3_ref.dtype), w3_ref[...],
                          preferred_element_type=jnp.float32) + b3_ref[...]
                  ).astype(o_ref.dtype)


def _pick_block(B, block_b):
    """Static (trace-time) batch-tile choice: big tiles, but >=2 grid steps
    for larger batches so v7x's two TensorCores can both be used."""
    if B <= 16:
        return B
    bb = min(block_b, -(-B // 2))        # at most ceil(B/2) -> >=2 grid steps
    bb = max(8, (bb // 8) * 8)           # keep sublane (8) alignment
    return min(bb, B)


@functools.partial(jax.jit, static_argnames=("block_b",))
def experimental_model_forward(x, params, block_b=1024):
    """x: (B, input_size) float32. params: dict of (in,out) weights + (1,out) biases."""
    w1, b1 = params["w1"], params["b1"]
    w2, b2 = params["w2"], params["b2"]
    w3, b3 = params["w3"], params["b3"]

    # --- host/XLA-side fusion of the first two linear layers (done once) ---
    w12 = w1 @ w2                        # (input_size, hidden_size)
    b12 = b1 @ w2 + b2                   # (1, hidden_size), stays f32

    # --- lane-dense output: pad num_classes up to a multiple of 128 ---
    num_classes = w3.shape[1]
    n_pad = ((num_classes + _LANE - 1) // _LANE) * _LANE
    w3p = jnp.pad(w3, ((0, 0), (0, n_pad - num_classes)))
    b3p = jnp.pad(b3, ((0, 0), (0, n_pad - num_classes)))  # stays f32

    # --- bf16 matmul operands (f32 accumulation inside the kernel) ---
    xb = x.astype(jnp.bfloat16)
    w12b = w12.astype(jnp.bfloat16)
    w3b = w3p.astype(jnp.bfloat16)

    B, D = x.shape
    bb = _pick_block(B, block_b)
    grid = (pl.cdiv(B, bb),)

    # Weights / biases are tiny: every grid step gets the full tensor.
    def full(a):
        return pl.BlockSpec(a.shape, lambda i: (0,) * a.ndim)

    out = pl.pallas_call(
        _mlp_kernel,
        out_shape=jax.ShapeDtypeStruct((B, n_pad), jnp.float32),
        grid_spec=pltpu.PrefetchScalarGridSpec(
            num_scalar_prefetch=0,
            grid=grid,
            in_specs=[
                pl.BlockSpec((bb, D), lambda i: (i, 0)),  # x tile
                full(w12b), full(b12),
                full(w3b), full(b3p),
            ],
            out_specs=pl.BlockSpec((bb, n_pad), lambda i: (i, 0)),
        ),
        compiler_params=pltpu.CompilerParams(
            dimension_semantics=("parallel",)),
    )(xb, w12b, b12, w3b, b3p)

    return out[:, :num_classes]


def init_params(key, input_size, pca_size, hidden_size, num_classes):
    """Deterministic synthetic parameters (shapes match the nn.Linear layers)."""
    ks = jax.random.split(key, 6)

    def linear(kw, kb, fan_in, fan_out):
        # torch.nn.Linear default init: U(-1/sqrt(fan_in), 1/sqrt(fan_in))
        bound = 1.0 / jnp.sqrt(fan_in)
        w = jax.random.uniform(kw, (fan_in, fan_out), jnp.float32, -bound, bound)
        b = jax.random.uniform(kb, (1, fan_out), jnp.float32, -bound, bound)
        return w, b

    w1, b1 = linear(ks[0], ks[1], input_size, pca_size)
    w2, b2 = linear(ks[2], ks[3], pca_size, hidden_size)
    w3, b3 = linear(ks[4], ks[5], hidden_size, num_classes)
    return {"w1": w1, "b1": b1, "w2": w2, "b2": b2, "w3": w3, "b3": b3}


def _reference_f32(x, p):
    """Layer-by-layer f32 reference matching the PyTorch forward (eval mode)."""
    h0 = x @ p["w1"] + p["b1"]
    h1 = jnp.maximum(h0 @ p["w2"] + p["b2"], 0.0)
    return h1 @ p["w3"] + p["b3"]


def _reference_bf16(x, p):
    """Reference that emulates the kernel's bf16/f32 mixed-precision path."""
    f32 = jnp.float32
    bf = lambda a: a.astype(jnp.bfloat16).astype(f32)
    w12 = p["w1"] @ p["w2"]
    b12 = p["b1"] @ p["w2"] + p["b2"]
    h = jnp.maximum(bf(x) @ bf(w12) + b12, 0.0)
    return bf(h) @ bf(p["w3"]) + p["b3"]


if __name__ == "__main__":
    # Small shapes consistent with the module's constructor; batch large
    # enough to exercise a multi-step batch grid (2 steps of 128 rows).
    batch, input_size, pca_size, hidden_size, num_classes = 256, 32, 16, 32, 10

    key = jax.random.PRNGKey(0)
    kx, kp = jax.random.split(key)
    x = jax.random.normal(kx, (batch, input_size), dtype=jnp.float32)
    params = init_params(kp, input_size, pca_size, hidden_size, num_classes)

    out = experimental_model_forward(x, params)
    out = jax.block_until_ready(out)

    assert out.shape == (batch, num_classes)

    # Strict check vs a reference that uses the same bf16/f32 mixed precision.
    ref_bf16 = _reference_bf16(x, params)
    assert jnp.allclose(out, ref_bf16, atol=1e-4, rtol=1e-4), (
        jnp.max(jnp.abs(out - ref_bf16)))

    # Loose sanity check vs the pure-f32 layer-by-layer PyTorch-style reference.
    ref_f32 = _reference_f32(x, params)
    assert jnp.allclose(out, ref_f32, atol=3e-2, rtol=3e-2), (
        jnp.max(jnp.abs(out - ref_f32)))

    print("KERNEL_OK")
</pallas_src>

<mosaic_0001>
module attributes {stable_mosaic.version = 11 : i64} {
  func.func @_mlp_kernel(%arg0: i32, %arg1: memref<128x32xbf16, #tpu.memory_space<vmem>>, %arg2: memref<32x32xbf16, #tpu.memory_space<vmem>>, %arg3: memref<1x32xf32, #tpu.memory_space<vmem>>, %arg4: memref<32x128xbf16, #tpu.memory_space<vmem>>, %arg5: memref<1x128xf32, #tpu.memory_space<vmem>>, %arg6: memref<128x128xf32, #tpu.memory_space<vmem>>) attributes {dimension_semantics = [#tpu.dimension_semantics<parallel>], iteration_bounds = array<i64: 2>, scalar_prefetch = 0 : i64, scratch_operands = 0 : i64, tpu.core_type = #tpu.core_type<tc>, window_params = [{transform_indices = @transform_0, window_bounds = array<i64: 128, 32>}, {pipeline_mode = #tpu.pipeline_mode<synchronous>, transform_indices = @transform_1, window_bounds = array<i64: 32, 32>}, {pipeline_mode = #tpu.pipeline_mode<synchronous>, transform_indices = @transform_2, window_bounds = array<i64: 1, 32>}, {pipeline_mode = #tpu.pipeline_mode<synchronous>, transform_indices = @transform_3, window_bounds = array<i64: 32, 128>}, {pipeline_mode = #tpu.pipeline_mode<synchronous>, transform_indices = @transform_4, window_bounds = array<i64: 1, 128>}, {transform_indices = @transform_5, window_bounds = array<i64: 128, 128>}]} {
    %c0 = arith.constant 0 : index
    %c0_0 = arith.constant 0 : index
    %0 = vector.load %arg1[%c0, %c0_0] : memref<128x32xbf16, #tpu.memory_space<vmem>>, vector<128x32xbf16>
    %c0_1 = arith.constant 0 : index
    %c0_2 = arith.constant 0 : index
    %1 = vector.load %arg2[%c0_1, %c0_2] : memref<32x32xbf16, #tpu.memory_space<vmem>>, vector<32x32xbf16>
    %cst = arith.constant dense<0.000000e+00> : vector<128x32xf32>
    %2 = tpu.matmul %0, %1, %cst {dimension_numbers = #tpu.dot_dimension_numbers<[1], [0], [0], [1], [0, 0, 1, 1], [], []>} : vector<128x32xbf16>, vector<32x32xbf16>, vector<128x32xf32> -> vector<128x32xf32>
    %c0_3 = arith.constant 0 : index
    %c0_4 = arith.constant 0 : index
    %3 = vector.load %arg3[%c0_3, %c0_4] : memref<1x32xf32, #tpu.memory_space<vmem>>, vector<1x32xf32>
    %4 = vector.broadcast %3 : vector<1x32xf32> to vector<128x32xf32>
    %5 = arith.addf %2, %4 : vector<128x32xf32>
    %cst_5 = arith.constant 0.000000e+00 : f32
    %6 = vector.broadcast %cst_5 : f32 to vector<128x32xf32>
    %7 = arith.maximumf %5, %6 : vector<128x32xf32>
    %8 = arith.truncf %7 : vector<128x32xf32> to vector<128x32xbf16>
    %c0_6 = arith.constant 0 : index
    %c0_7 = arith.constant 0 : index
    %9 = vector.load %arg4[%c0_6, %c0_7] : memref<32x128xbf16, #tpu.memory_space<vmem>>, vector<32x128xbf16>
    %cst_8 = arith.constant dense<0.000000e+00> : vector<128x128xf32>
    %10 = tpu.matmul %8, %9, %cst_8 {dimension_numbers = #tpu.dot_dimension_numbers<[1], [0], [0], [1], [0, 0, 1, 1], [], []>} : vector<128x32xbf16>, vector<32x128xbf16>, vector<128x128xf32> -> vector<128x128xf32>
    %c0_9 = arith.constant 0 : index
    %c0_10 = arith.constant 0 : index
    %11 = vector.load %arg5[%c0_9, %c0_10] : memref<1x128xf32, #tpu.memory_space<vmem>>, vector<1x128xf32>
    %12 = vector.broadcast %11 : vector<1x128xf32> to vector<128x128xf32>
    %13 = arith.addf %10, %12 : vector<128x128xf32>
    %c0_11 = arith.constant 0 : index
    %c0_12 = arith.constant 0 : index
    %14 = vector.load %arg6[%c0_11, %c0_12] : memref<128x128xf32, #tpu.memory_space<vmem>>, vector<128x128xf32>
    tpu.vector_store %arg6[%c0_11, %c0_12], %13 {strides = array<i32>} : memref<128x128xf32, #tpu.memory_space<vmem>>, vector<128x128xf32>,
    return
  }
  func.func @transform_0(%arg0: i32) -> (i32, i32) {
    %c0_i32 = arith.constant 0 : i32
    %c0_i32_0 = arith.constant 0 : i32
    return %arg0, %c0_i32 : i32, i32
  }
  func.func @transform_1(%arg0: i32) -> (i32, i32) {
    %c0_i32 = arith.constant 0 : i32
    %c0_i32_0 = arith.constant 0 : i32
    %c0_i32_1 = arith.constant 0 : i32
    return %c0_i32, %c0_i32_0 : i32, i32
  }
  func.func @transform_2(%arg0: i32) -> (i32, i32) {
    %c0_i32 = arith.constant 0 : i32
    %c0_i32_0 = arith.constant 0 : i32
    %c0_i32_1 = arith.constant 0 : i32
    return %c0_i32, %c0_i32_0 : i32, i32
  }
  func.func @transform_3(%arg0: i32) -> (i32, i32) {
    %c0_i32 = arith.constant 0 : i32
    %c0_i32_0 = arith.constant 0 : i32
    %c0_i32_1 = arith.constant 0 : i32
    return %c0_i32, %c0_i32_0 : i32, i32
  }
  func.func @transform_4(%arg0: i32) -> (i32, i32) {
    %c0_i32 = arith.constant 0 : i32
    %c0_i32_0 = arith.constant 0 : i32
    %c0_i32_1 = arith.constant 0 : i32
    return %c0_i32, %c0_i32_0 : i32, i32
  }
  func.func @transform_5(%arg0: i32) -> (i32, i32) {
    %c0_i32 = arith.constant 0 : i32
    %c0_i32_0 = arith.constant 0 : i32
    return %arg0, %c0_i32 : i32, i32
  }
}

</mosaic_0001>

<bundles_post_ra>
// kernel: experimental_model_forward.1
= control target key start
LH: loop header
LB: loop body
LE: loop exit
PB: predicated region body
PF: predicated region fallthrough
CT: control target
= control target key end

     0   :  { %s829_s18 = smov 0   ;;  %s902_s0 = inlined_call_operand.vmem [shape: bf16[256,32], index: 0, kind: input, shape index: {}]   ;;  %s903_s1 = inlined_call_operand.vmem [shape: bf16[32,32], index: 1, kind: input, shape index: {}]   ;;  %s904_s2 = inlined_call_operand.vmem [shape: f32[1,32], index: 2, kind: input, shape index: {}]   ;;  %s905_s3 = inlined_call_operand.vmem [shape: bf16[32,128], index: 3, kind: input, shape index: {}]   ;;  %s906_s4 = inlined_call_operand.vmem [shape: f32[1,128], index: 4, kind: input, shape index: {}]   ;;  %s907_s5 = inlined_call_operand.vmem [shape: f32[256,128], index: 5, kind: output, shape index: {}]  }
   0x1 LB: > { %s670_s19 = sadd.s32 4294967295, %s797_s18   ;;  %p674_p0 = scmp.ge.s32.totalorder %s797_s18, 1  ;;  %s797_s18 = sphi %s829_s18, %s15_s18  }
   0x2   : > { %p188_p1 = scmp.lt.s32.totalorder %s797_s18, 3 }
   0x4   : > { %p189_p2 = pnand %p674_p0, %p188_p1 }
   0x5   : > { %s675_s22 = sshll.u32 (!%p189_p2), %s670_s19, 4 }
   0x6   : > { %192 = sbr.rel (%p189_p2) target bundleno = 452 (0x1c4), region = 40  ;;  %p217_p3 = scmp.lt.s32.totalorder (!%p189_p2), %s675_s22, 31 }
   0xb   : > { %v779_v0 = vld [vmem:[%s903_s1 + $0x8] sm:$0xff]   ;;  %v780_v1 = vld [vmem:[%s903_s1] sm:$0xff]   ;;  %s909_s22 = smov (!%p217_p3, %s675_s22), 31  ;;  %vm308_vm0 = vcmask 261120  }
   0xc   : > { %731 = vmatprep.subr.bf16.mxu0 %v779_v0  ;;  %s676_s25 = sshll.u32 %s909_s22, 2  ;;  %v789_v10 = vld [vmem:[%s905_s3 + $0x8] sm:$0xff]   ;;  %v790_v11 = vld [vmem:[%s905_s3] sm:$0xff]   ;;  %s678_s10 = sshll.u32 %s909_s22, 3 }
   0xd   : > { %732 = vmatpush3.bf16.msra.mxu0 %v779_v0  ;;  %s220_s28 = scalar_lea.vmem %s902_s0, %s676_s25  ;;  %751 = vmatprep.subr.bf16.mxu1 %v789_v10  ;;  %v679_v14 = vld [vmem:[%s904_s2] ss:$0 sm:$0xff]  ;;  %s881_s15 = scalar_lea.vmem %s907_s5, %s678_s10 }
   0xe   : > { %733 = vmatprep.subr.bf16.mxu0 %v780_v1  ;;  %v781_v2 = vld [vmem:[%s220_s28] sm:$0xff]   ;;  %v782_v3 = vld [vmem:[%s220_s28 + $0x8] sm:$0xff]   ;;  %v783_v4 = vld [vmem:[%s220_s28 + $0x10] sm:$0xff]   ;;  %752 = vmatpush3.bf16.msra.mxu1 %v789_v10 }
   0xf   : > { %735 = vmatprep.mubr.msk.bf16.mxu0 %vm308_vm0, %v781_v2  ;;  %v784_v5 = vld [vmem:[%s220_s28 + $0x18] sm:$0xff]   ;;  %v785_v6 = vld [vmem:[%s220_s28 + $0x20] sm:$0xff]   ;;  %v786_v7 = vld [vmem:[%s220_s28 + $0x28] sm:$0xff]   ;;  %753 = vmatprep.subr.bf16.mxu1 %v790_v11 }
  0x10   : > { %v787_v8 = vld [vmem:[%s220_s28 + $0x30] sm:$0xff]   ;;  %v788_v9 = vld [vmem:[%s220_s28 + $0x38] sm:$0xff]  }
  0x11   : > { %734 = vmatpush3.bf16.msra.mxu0 %v780_v1 }
  0x12   : > { %754 = vmatpush3.bf16.msra.mxu1 %v790_v11 }
  0x14   : > { %736 = vmatmul.mubr.msk.bf16.vlgmr.msra.gmra.mxu0 %vm308_vm0, %v782_v3 }
  0x15   : > { %739 = vmatprep.mubr.msk.bf16.mxu0 %vm308_vm0, %v783_v4 }
  0x1c   : > { %740 = vmatmul.mubr.msk.bf16.gmra.mxu0 %vm308_vm0, %v784_v5  ;;  %v698_v5 = vld [vmem:[%s906_s4] ss:$0 sm:$0xff] }
  0x1d   : > { %743 = vmatprep.mubr.msk.bf16.mxu0 %vm308_vm0, %v785_v6 }
  0x24   : > { %744 = vmatmul.mubr.msk.bf16.gmra.mxu0 %vm308_vm0, %v786_v7 }
  0x25   : > { %747 = vmatprep.mubr.msk.bf16.mxu0 %vm308_vm0, %v787_v8 }
  0x2c   : > { %748 = vmatmul.mubr.msk.bf16.gmra.mxu0 %vm308_vm0, %v788_v9 }
  0xd4   : > { %v737_v12 = vpop.f32.mrf.mxu0 }
  0xd5   : > { %v376_v18 = vadd.f32 %v737_v12, %v679_v14 }
  0xd6   : > { %v367_v13 = vpop.f32.mrf.mxu0 }
  0xd7   : > { %v368_v16 = vadd.f32 %v679_v14, %v367_v13  ;;  %v432_v25 = vmax.f32 %v376_v18, 0.0 }
  0xd8   : > { %v738_v15 = vpop.f32.mrf.mxu0 }
  0xd9   : > { %v379_v17 = vadd.f32 %v738_v15, %v679_v14  ;;  %v430_v23 = vmax.f32 %v368_v16, 0.0 }
  0xda   : > { %v370_v19 = vpop.f32.mrf.mxu0 }
  0xdb   : > { %v371_v20 = vadd.f32 %v679_v14, %v370_v19  ;;  %v433_v21 = vmax.f32 %v379_v17, 0.0 }
  0xdc   : > { %v741_v22 = vpop.f32.mrf.mxu0 }
  0xdd   : > { %v431_v24 = vmax.f32 %v371_v20, 0.0  ;;  %v447_v28 = vpack.c.bf16 %v433_v21, %v432_v25  ;;  %v392_v32 = vadd.f32 %v741_v22, %v679_v14 }
  0xde   : > { %v383_v26 = vpop.f32.mrf.mxu0 }
  0xdf   : > { %v446_v27 = vpack.c.bf16 %v431_v24, %v430_v23  ;;  %v384_v30 = vadd.f32 %v679_v14, %v383_v26  ;;  %v436_v39 = vmax.f32 %v392_v32, 0.0 }
  0xe0   : > { %v742_v29 = vpop.f32.mrf.mxu0 }
  0xe1   : > { %v395_v31 = vadd.f32 %v742_v29, %v679_v14  ;;  %755 = vmatprep.mubr.msk.bf16.mxu1 %vm308_vm0, %v446_v27  ;;  %v434_v37 = vmax.f32 %v384_v30, 0.0 }
  0xe2   : > { %v386_v33 = vpop.f32.mrf.mxu0  ;;  %756 = vmatmul.mubr.msk.bf16.vlgmr.msra.gmra.mxu1 %vm308_vm0, %v447_v28 }
  0xe3   : > { %v387_v34 = vadd.f32 %v679_v14, %v386_v33  ;;  %v437_v35 = vmax.f32 %v395_v31, 0.0 }
  0xe4   : > { %v745_v36 = vpop.f32.mrf.mxu0 }
  0xe5   : > { %v435_v38 = vmax.f32 %v387_v34, 0.0  ;;  %v449_v42 = vpack.c.bf16 %v437_v35, %v436_v39  ;;  %v408_v46 = vadd.f32 %v745_v36, %v679_v14 }
  0xe6   : > { %v399_v40 = vpop.f32.mrf.mxu0 }
  0xe7   : > { %v448_v41 = vpack.c.bf16 %v435_v38, %v434_v37  ;;  %v400_v44 = vadd.f32 %v679_v14, %v399_v40  ;;  %v440_v53 = vmax.f32 %v408_v46, 0.0 }
  0xe8   : > { %v746_v43 = vpop.f32.mrf.mxu0 }
  0xe9   : > { %v411_v45 = vadd.f32 %v746_v43, %v679_v14  ;;  %759 = vmatprep.mubr.msk.bf16.mxu1 %vm308_vm0, %v448_v41  ;;  %v438_v51 = vmax.f32 %v400_v44, 0.0 }
  0xea   : > { %v402_v47 = vpop.f32.mrf.mxu0  ;;  %760 = vmatmul.mubr.msk.bf16.gmra.mxu1 %vm308_vm0, %v449_v42 }
  0xeb   : > { %v403_v48 = vadd.f32 %v679_v14, %v402_v47  ;;  %v441_v49 = vmax.f32 %v411_v45, 0.0 }
  0xec   : > { %v749_v50 = vpop.f32.mrf.mxu0 }
  0xed   : > { %v439_v52 = vmax.f32 %v403_v48, 0.0  ;;  %v451_v56 = vpack.c.bf16 %v441_v49, %v440_v53  ;;  %v424_v60 = vadd.f32 %v749_v50, %v679_v14 }
  0xee   : > { %v415_v54 = vpop.f32.mrf.mxu0 }
  0xef   : > { %v450_v55 = vpack.c.bf16 %v439_v52, %v438_v51  ;;  %v416_v58 = vadd.f32 %v679_v14, %v415_v54  ;;  %v444_v2 = vmax.f32 %v424_v60, 0.0 }
  0xf0   : > { %v750_v57 = vpop.f32.mrf.mxu0 }
  0xf1   : > { %v427_v59 = vadd.f32 %v750_v57, %v679_v14  ;;  %763 = vmatprep.mubr.msk.bf16.mxu1 %vm308_vm0, %v450_v55  ;;  %v442_v0 = vmax.f32 %v416_v58, 0.0 }
  0xf2   : > { %v418_v61 = vpop.f32.mrf.mxu0  ;;  %764 = vmatmul.mubr.msk.bf16.gmra.mxu1 %vm308_vm0, %v451_v56 }
  0xf3   : > { %v419_v62 = vadd.f32 %v679_v14, %v418_v61  ;;  %v445_v63 = vmax.f32 %v427_v59, 0.0 }
  0xf5   : > { %v443_v1 = vmax.f32 %v419_v62, 0.0  ;;  %v453_v4 = vpack.c.bf16 %v445_v63, %v444_v2 }
  0xf7   : > { %v452_v3 = vpack.c.bf16 %v443_v1, %v442_v0 }
  0xf9   : > { %767 = vmatprep.mubr.msk.bf16.mxu1 %vm308_vm0, %v452_v3 }
  0xfa   : > { %768 = vmatmul.mubr.msk.bf16.gmra.mxu1 %vm308_vm0, %v453_v4 }
 0x1a2   : > { %v757_v6 = vpop.f32.mrf.mxu1 }
 0x1a3   : > { %v544_v7 = vadd.f32 %v757_v6, %v698_v5 }
 0x1a4   : > { %v535_v8 = vpop.f32.mrf.mxu1 }
 0x1a5   : > { %600 = vst [vmem:[%s881_s15 + $0x10] sm:$0xff] %v544_v7  ;;  %v536_v9 = vadd.f32 %v698_v5, %v535_v8 }
 0x1a6   : > { %v758_v10 = vpop.f32.mrf.mxu1 }
 0x1a7   : > { %598 = vst [vmem:[%s881_s15] sm:$0xff] %v536_v9  ;;  %v547_v11 = vadd.f32 %v758_v10, %v698_v5 }
 0x1a8   : > { %v538_v12 = vpop.f32.mrf.mxu1 }
 0x1a9   : > { %601 = vst [vmem:[%s881_s15 + $0x18] sm:$0xff] %v547_v11  ;;  %v539_v13 = vadd.f32 %v698_v5, %v538_v12 }
 0x1aa   : > { %v761_v14 = vpop.f32.mrf.mxu1 }
 0x1ab   : > { %599 = vst [vmem:[%s881_s15 + $0x8] sm:$0xff] %v539_v13  ;;  %v560_v15 = vadd.f32 %v761_v14, %v698_v5 }
 0x1ac   : > { %v551_v16 = vpop.f32.mrf.mxu1 }
 0x1ad   : > { %604 = vst [vmem:[%s881_s15 + $0x30] sm:$0xff] %v560_v15  ;;  %v552_v17 = vadd.f32 %v698_v5, %v551_v16 }
 0x1ae   : > { %v762_v18 = vpop.f32.mrf.mxu1 }
 0x1af   : > { %602 = vst [vmem:[%s881_s15 + $0x20] sm:$0xff] %v552_v17  ;;  %v563_v19 = vadd.f32 %v762_v18, %v698_v5 }
 0x1b0   : > { %v554_v20 = vpop.f32.mrf.mxu1 }
 0x1b1   : > { %605 = vst [vmem:[%s881_s15 + $0x38] sm:$0xff] %v563_v19  ;;  %v555_v21 = vadd.f32 %v698_v5, %v554_v20 }
 0x1b2   : > { %v765_v22 = vpop.f32.mrf.mxu1 }
 0x1b3   : > { %603 = vst [vmem:[%s881_s15 + $0x28] sm:$0xff] %v555_v21  ;;  %v576_v23 = vadd.f32 %v765_v22, %v698_v5 }
 0x1b4   : > { %v567_v24 = vpop.f32.mrf.mxu1 }
 0x1b5   : > { %608 = vst [vmem:[%s881_s15 + $0x50] sm:$0xff] %v576_v23  ;;  %v568_v25 = vadd.f32 %v698_v5, %v567_v24 }
 0x1b6   : > { %v766_v26 = vpop.f32.mrf.mxu1 }
 0x1b7   : > { %606 = vst [vmem:[%s881_s15 + $0x40] sm:$0xff] %v568_v25  ;;  %v579_v27 = vadd.f32 %v766_v26, %v698_v5 }
 0x1b8   : > { %v570_v28 = vpop.f32.mrf.mxu1 }
 0x1b9   : > { %609 = vst [vmem:[%s881_s15 + $0x58] sm:$0xff] %v579_v27  ;;  %v571_v29 = vadd.f32 %v698_v5, %v570_v28 }
 0x1ba   : > { %v769_v30 = vpop.f32.mrf.mxu1 }
 0x1bb   : > { %607 = vst [vmem:[%s881_s15 + $0x48] sm:$0xff] %v571_v29  ;;  %v592_v31 = vadd.f32 %v769_v30, %v698_v5 }
 0x1bc   : > { %v583_v32 = vpop.f32.mrf.mxu1 }
 0x1bd   : > { %612 = vst [vmem:[%s881_s15 + $0x70] sm:$0xff] %v592_v31  ;;  %v584_v33 = vadd.f32 %v698_v5, %v583_v32 }
 0x1be   : > { %v770_v34 = vpop.f32.mrf.mxu1 }
 0x1bf   : > { %610 = vst [vmem:[%s881_s15 + $0x60] sm:$0xff] %v584_v33  ;;  %v595_v35 = vadd.f32 %v770_v34, %v698_v5 }
 0x1c0   : > { %v586_v36 = vpop.f32.mrf.mxu1 }
 0x1c1   : > { %613 = vst [vmem:[%s881_s15 + $0x78] sm:$0xff] %v595_v35  ;;  %v587_v37 = vadd.f32 %v698_v5, %v586_v36 }
 0x1c3   : > { %611 = vst [vmem:[%s881_s15 + $0x68] sm:$0xff] %v587_v37 }
 0x1c4 PF: > { %s15_s18 = sadd.s32 1, %s797_s18  }
 0x1c5   : > { %p12_p4 = scmp.ge.s32.totalorder %s15_s18, 4  }
 0x1c7   :  { %14 = sbr.rel (!%p12_p4) target bundleno = 1 (0x1), region = 70 }

</bundles_post_ra>
